<compile_context>
chip_gen: v7x
topology: tpu7x:2x2x1
jax: 0.10.0
libtpu: 0.0.40
codegen_flags: <defaults>
</compile_context>

<pallas_src>
import jax
import jax.numpy as jnp
from jax.experimental import pallas as pl
from jax.experimental.pallas import tpu as pltpu


def _round_up(n, m):
    return ((n + m - 1) // m) * m


def _pick_block(batch):
    """Batch block: multiple of 8 (sublane), >=2 grid steps when possible,
    capped at 1024 so double-buffered tiles stay tiny on all chips."""
    b8 = _round_up(batch, 8)
    if b8 <= 8:
        return 8
    half = _round_up(b8 // 2, 8)
    return min(1024, half)


def _verhor_kernel(x_ref, wkt_ref, b_ref, o_ref):
    # x_ref  : (blk_b, K)  bf16   flattened batch block   (K = hor_in*ver_in)
    # wkt_ref: (K, N)      bf16   kron(W_hor, W_ver)^T    (N = hor_out*ver_out)
    # b_ref  : (1, N)      f32    flattened bias
    # o_ref  : (blk_b, N)  out_dtype
    z = jnp.dot(x_ref[...], wkt_ref[...], preferred_element_type=jnp.float32)
    o_ref[...] = (z + b_ref[...]).astype(o_ref.dtype)


@jax.jit
def verhor_mat(x, w_ver, w_hor, b):
    """x: (batch, hor_in, ver_in) -> (batch, hor_out, ver_out) = Wh @ x @ Wv^T + B."""
    batch, hor_in, ver_in = x.shape
    ver_out = w_ver.shape[0]
    hor_out = w_hor.shape[0]
    K = hor_in * ver_in
    N = hor_out * ver_out
    out_dtype = x.dtype
    compute_dtype = jnp.bfloat16

    # One-time wrapper-side plumbing (hoisted out of the kernel):
    #   out_flat[b] = x_flat[b] @ kron(W_hor, W_ver)^T + b_flat
    # kron built in f32, rounded to bf16 exactly once.
    w_kron_t = jnp.kron(
        w_hor.astype(jnp.float32), w_ver.astype(jnp.float32)
    ).T.astype(compute_dtype)                       # (K, N)
    b_flat = b.astype(jnp.float32).reshape(1, N)    # (1, N)

    blk_b = _pick_block(batch)
    batch_p = _round_up(batch, blk_b)

    x_flat = x.reshape(batch, K).astype(compute_dtype)
    if batch_p != batch:
        x_flat = jnp.pad(x_flat, ((0, batch_p - batch), (0, 0)))

    out_bytes = batch_p * N * jnp.dtype(out_dtype).itemsize
    cost = pl.CostEstimate(
        flops=2 * batch_p * K * N,
        transcendentals=0,
        bytes_accessed=batch_p * K * 2 + K * N * 2 + N * 4 + out_bytes,
    )

    out = pl.pallas_call(
        _verhor_kernel,
        out_shape=jax.ShapeDtypeStruct((batch_p, N), out_dtype),
        grid_spec=pltpu.PrefetchScalarGridSpec(
            num_scalar_prefetch=0,
            grid=(batch_p // blk_b,),
            in_specs=[
                pl.BlockSpec((blk_b, K), lambda i: (i, 0)),
                # Grid-invariant weight / bias tiles.
                pl.BlockSpec((K, N), lambda i: (0, 0)),
                pl.BlockSpec((1, N), lambda i: (0, 0)),
            ],
            out_specs=pl.BlockSpec((blk_b, N), lambda i: (i, 0)),
        ),
        compiler_params=pltpu.CompilerParams(
            dimension_semantics=("parallel",)),
        cost_estimate=cost,
    )(x_flat, w_kron_t, b_flat)

    return out[:batch].reshape(batch, hor_out, ver_out)


def reference_f32(x, w_ver, w_hor, b):
    y = jnp.einsum("bhv,ov->bho", x, w_ver)          # self.ver
    z = jnp.einsum("ph,bho->bpo", w_hor, y)          # self.hor on transpose
    return z + b[None]                               # + self.b


def reference_matched(x, w_ver, w_hor, b, compute_dtype=jnp.bfloat16):
    # Same kron-fold / bf16-input / f32-accumulation recipe as the kernel.
    batch = x.shape[0]
    wk = jnp.kron(w_hor.astype(jnp.float32),
                  w_ver.astype(jnp.float32)).astype(compute_dtype)
    xf = x.reshape(batch, -1).astype(compute_dtype)
    zf = jnp.dot(xf, wk.T, preferred_element_type=jnp.float32)
    return zf.reshape(batch, w_hor.shape[0], w_ver.shape[0]) + b[None]


if __name__ == "__main__":
    # Small shapes consistent with the module's forward.
    batch, hor_in, ver_in = 2, 8, 32
    ver_out, hor_out = 16, 8

    key = jax.random.PRNGKey(0)
    kx, kv, kh, kb = jax.random.split(key, 4)

    x = jax.random.normal(kx, (batch, hor_in, ver_in), dtype=jnp.float32)
    # nn.Linear weights (deterministic synthetic init, bias=False).
    w_ver = jax.random.normal(kv, (ver_out, ver_in), dtype=jnp.float32) * 0.1
    w_hor = jax.random.normal(kh, (hor_out, hor_in), dtype=jnp.float32) * 0.1
    # xavier_normal_ with gain = calculate_gain('relu') = sqrt(2)
    gain = jnp.sqrt(2.0)
    std = gain * jnp.sqrt(2.0 / (hor_out + ver_out))
    b = jax.random.normal(kb, (hor_out, ver_out), dtype=jnp.float32) * std

    out = verhor_mat(x, w_ver, w_hor, b)
    jax.block_until_ready(out)
    assert out.shape == (batch, hor_out, ver_out)

    # Tight check against a reference using the same bf16 kron-fold recipe.
    ref_m = reference_matched(x, w_ver, w_hor, b)
    assert jnp.allclose(out, ref_m, atol=2e-3, rtol=2e-3)

    # Looser sanity check against the full-f32 module semantics
    # (difference is only bf16 rounding of x and of the kron weight).
    ref = reference_f32(x, w_ver, w_hor, b)
    assert jnp.allclose(out, ref, atol=2e-2, rtol=2e-2)

    print("KERNEL_OK")
</pallas_src>

<mosaic_0001>
module attributes {stable_mosaic.version = 11 : i64} {
  func.func @_verhor_kernel(%arg0: i32, %arg1: memref<8x256xbf16, #tpu.memory_space<vmem>>, %arg2: memref<256x128xbf16, #tpu.memory_space<vmem>>, %arg3: memref<1x128xf32, #tpu.memory_space<vmem>>, %arg4: memref<8x128xf32, #tpu.memory_space<vmem>>) attributes {dimension_semantics = [#tpu.dimension_semantics<parallel>], iteration_bounds = array<i64: 1>, scalar_prefetch = 0 : i64, scratch_operands = 0 : i64, tpu.core_type = #tpu.core_type<tc>, window_params = [{transform_indices = @transform_0, window_bounds = array<i64: 8, 256>}, {pipeline_mode = #tpu.pipeline_mode<synchronous>, transform_indices = @transform_1, window_bounds = array<i64: 256, 128>}, {pipeline_mode = #tpu.pipeline_mode<synchronous>, transform_indices = @transform_2, window_bounds = array<i64: 1, 128>}, {transform_indices = @transform_3, window_bounds = array<i64: 8, 128>}]} {
    %c0 = arith.constant 0 : index
    %c0_0 = arith.constant 0 : index
    %0 = vector.load %arg1[%c0, %c0_0] : memref<8x256xbf16, #tpu.memory_space<vmem>>, vector<8x256xbf16>
    %c0_1 = arith.constant 0 : index
    %c0_2 = arith.constant 0 : index
    %1 = vector.load %arg2[%c0_1, %c0_2] : memref<256x128xbf16, #tpu.memory_space<vmem>>, vector<256x128xbf16>
    %cst = arith.constant dense<0.000000e+00> : vector<8x128xf32>
    %2 = tpu.matmul %0, %1, %cst {dimension_numbers = #tpu.dot_dimension_numbers<[1], [0], [0], [1], [0, 0, 1, 1], [], []>} : vector<8x256xbf16>, vector<256x128xbf16>, vector<8x128xf32> -> vector<8x128xf32>
    %c0_3 = arith.constant 0 : index
    %c0_4 = arith.constant 0 : index
    %3 = vector.load %arg3[%c0_3, %c0_4] : memref<1x128xf32, #tpu.memory_space<vmem>>, vector<1x128xf32>
    %4 = vector.broadcast %3 : vector<1x128xf32> to vector<8x128xf32>
    %5 = arith.addf %2, %4 : vector<8x128xf32>
    %c0_5 = arith.constant 0 : index
    %c0_6 = arith.constant 0 : index
    %6 = vector.load %arg4[%c0_5, %c0_6] : memref<8x128xf32, #tpu.memory_space<vmem>>, vector<8x128xf32>
    tpu.vector_store %arg4[%c0_5, %c0_6], %5 {strides = array<i32>} : memref<8x128xf32, #tpu.memory_space<vmem>>, vector<8x128xf32>,
    return
  }
  func.func @transform_0(%arg0: i32) -> (i32, i32) {
    %c0_i32 = arith.constant 0 : i32
    %c0_i32_0 = arith.constant 0 : i32
    return %arg0, %c0_i32 : i32, i32
  }
  func.func @transform_1(%arg0: i32) -> (i32, i32) {
    %c0_i32 = arith.constant 0 : i32
    %c0_i32_0 = arith.constant 0 : i32
    %c0_i32_1 = arith.constant 0 : i32
    return %c0_i32, %c0_i32_0 : i32, i32
  }
  func.func @transform_2(%arg0: i32) -> (i32, i32) {
    %c0_i32 = arith.constant 0 : i32
    %c0_i32_0 = arith.constant 0 : i32
    %c0_i32_1 = arith.constant 0 : i32
    return %c0_i32, %c0_i32_0 : i32, i32
  }
  func.func @transform_3(%arg0: i32) -> (i32, i32) {
    %c0_i32 = arith.constant 0 : i32
    %c0_i32_0 = arith.constant 0 : i32
    return %arg0, %c0_i32 : i32, i32
  }
}

</mosaic_0001>

<bundles_post_ra>
// kernel: verhor_mat.1
= control target key start
LH: loop header
LB: loop body
LE: loop exit
PB: predicated region body
PF: predicated region fallthrough
CT: control target
= control target key end

     0   :  { %s339_s1 = inlined_call_operand.vmem [shape: bf16[256,128], index: 1, kind: input, shape index: {}]   ;;  %s340_s0 = inlined_call_operand.vmem [shape: bf16[8,256], index: 0, kind: input, shape index: {}]   ;;  %s341_s2 = inlined_call_operand.vmem [shape: f32[1,128], index: 2, kind: input, shape index: {}]   ;;  %s342_s3 = inlined_call_operand.vmem [shape: f32[8,128], index: 3, kind: output, shape index: {}]  }
   0x1   :  { %v244_v0 = vld [vmem:[%s339_s1 + $0x40] sm:$0xff]   ;;  %v246_v2 = vld [vmem:[%s339_s1 + $0x48] sm:$0xff]   ;;  %v248_v4 = vld [vmem:[%s339_s1 + $0x50] sm:$0xff]  }
   0x2   :  { %v245_v1 = vld [vmem:[%s339_s1] sm:$0xff]   ;;  %222 = vmatprep.subr.bf16.mxu0 %v244_v0  ;;  %v247_v3 = vld [vmem:[%s339_s1 + $0x8] sm:$0xff]   ;;  %v249_v5 = vld [vmem:[%s339_s1 + $0x10] sm:$0xff]  }
   0x3   :  { %223 = vmatpush3.bf16.msra.mxu0 %v245_v1  ;;  %v250_v6 = vld [vmem:[%s339_s1 + $0x58] sm:$0xff]   ;;  %v252_v8 = vld [vmem:[%s339_s1 + $0x60] sm:$0xff]   ;;  %v254_v10 = vld [vmem:[%s339_s1 + $0x68] sm:$0xff]  }
   0x4   :  { %224 = vmatprep.subr.bf16.mxu0 %v246_v2  ;;  %v251_v7 = vld [vmem:[%s339_s1 + $0x18] sm:$0xff]   ;;  %v253_v9 = vld [vmem:[%s339_s1 + $0x20] sm:$0xff]   ;;  %v255_v13 = vld [vmem:[%s339_s1 + $0x28] sm:$0xff]  }
   0x5   :  { %v15_v11 = vld [vmem:[%s340_s0] sm:$0xff]  ;;  %v256_v14 = vld [vmem:[%s339_s1 + $0x70] sm:$0xff]   ;;  %v258_v16 = vld [vmem:[%s339_s1 + $0x78] sm:$0xff]  }
   0x6   :  { %v205_v12 = vcombine.high %v15_v11, %v15_v11  ;;  %v257_v15 = vld [vmem:[%s339_s1 + $0x30] sm:$0xff]   ;;  %v259_v17 = vld [vmem:[%s339_s1 + $0x38] sm:$0xff]   ;;  %v204_v18 = vcombine.low %v15_v11, %v15_v11  ;;  %v203_v20 = vld [vmem:[%s341_s2] ss:$0 sm:$0xff] }
   0x7   :  { %225 = vmatpush3.bf16.msra.mxu0 %v247_v3 }
   0x8   :  { %226 = vmatprep.subr.bf16.mxu0 %v248_v4  ;;  %190 = vmatprep.mubr.bf16.mxu0 %v205_v12 }
   0xb   :  { %227 = vmatpush3.bf16.msra.mxu0 %v249_v5 }
   0xc   :  { %228 = vmatprep.subr.bf16.mxu0 %v250_v6 }
   0xf   :  { %229 = vmatpush3.bf16.msra.mxu0 %v251_v7 }
  0x10   :  { %230 = vmatprep.subr.bf16.mxu0 %v252_v8 }
  0x13   :  { %231 = vmatpush3.bf16.msra.mxu0 %v253_v9 }
  0x14   :  { %232 = vmatprep.subr.bf16.mxu0 %v254_v10 }
  0x17   :  { %233 = vmatpush3.bf16.msra.mxu0 %v255_v13 }
  0x18   :  { %234 = vmatprep.subr.bf16.mxu0 %v256_v14 }
  0x1b   :  { %235 = vmatpush3.bf16.msra.mxu0 %v257_v15 }
  0x1c   :  { %236 = vmatprep.subr.bf16.mxu0 %v258_v16 }
  0x1f   :  { %237 = vmatpush3.bf16.msra.mxu0 %v259_v17 }
  0x22   :  { %191 = vmatmul.mubr.bf16.vlgmr.msra.gmra.mrb[0].mxu0 %v204_v18 }
  0xf5   :  { %v238_v19 = vpop.f32.mrb[0].mxu0 }
  0xf6   :  { %v239_v21 = vpop.f32.mrb[1].mxu0 }
  0xf7   :  { %v240_v22 = vadd.f32 %v239_v21, %v238_v19  ;;  %v241_v23 = vpop.f32.mrb[2].mxu0 }
  0xf8   :  { %v242_v24 = vpop.f32.mrb[3].mxu0 }
  0xf9   :  { %v193_v25 = vadd.f32 %v240_v22, %v203_v20 }
  0xfb   :  { %198 = vst [vmem:[%s342_s3] sm:$0xff] %v193_v25 }

</bundles_post_ra>
